<compile_context>
chip_gen: v5e
topology: v5e:2x2
jax: 0.10.0
libtpu: 0.0.40
codegen_flags: <defaults>
</compile_context>

<pallas_src>
import functools
import numpy as np
import jax
import jax.numpy as jnp
from jax import lax
from jax.experimental import pallas as pl
from jax.experimental.pallas import tpu as pltpu

WINDOW_SIZE = 11
SIGMA = 1.5
SSIM_C1 = 0.01 ** 2
SSIM_C2 = 0.03 ** 2


def _gaussian_1d(window_size=WINDOW_SIZE, sigma=SIGMA):
    xs = np.arange(window_size, dtype=np.float64)
    g = np.exp(-((xs - window_size // 2) ** 2) / (2.0 * sigma ** 2))
    g = g / g.sum()
    return g.astype(np.float32)


def _band_matrix(n, g1d=None):
    """M[i, j] = g[i - j + r] for |i - j| <= r (zero-padded correlation as matmul).
    Symmetric (Gaussian taps)."""
    if g1d is None:
        g1d = _gaussian_1d()
    r = len(g1d) // 2
    idx = np.arange(n)
    diff = idx[:, None] - idx[None, :]
    M = np.zeros((n, n), dtype=np.float32)
    mask = np.abs(diff) <= r
    M[mask] = g1d[(diff + r)[mask]]
    return M


def _loss_kernel(out_ref, tgt_ref, k_ref, loss_ref, *, C, H, W, Bs, epoch):
    # out_ref : (1, Bs*3*C, HW)   candidates for this step's Bs samples (flattened planes)
    # tgt_ref : (1, Bs*C,   HW)   targets
    # k_ref   : (HW, HW)          dense kron(mh, mw) Gaussian filter matrix (symmetric)
    # loss_ref: (1, 1, 1)         this step's summed loss
    HW = H * W
    K = k_ref[...]

    o = out_ref[...].reshape(Bs, 3, C, HW)
    tg = tgt_ref[...].reshape(Bs, C, HW)
    o0, o1, o2 = o[:, 0], o[:, 1], o[:, 2]            # each (Bs, C, HW)

    inv_chw = 1.0 / float(C * HW)

    def mse_sum(a, b):
        # sum over samples of per-sample mean((a-b)^2)  (same normalizer per sample)
        d = a - b
        return jnp.sum(d * d) * inv_chw

    def ssim_sum(mu1, mu2, e2_1, e2_2, e12):
        # sum over samples of per-sample mean SSIM map, from cached moments
        mu1mu2 = mu1 * mu2
        mu1sq = mu1 * mu1
        mu2sq = mu2 * mu2
        s1 = e2_1 - mu1sq
        s2 = e2_2 - mu2sq
        s12 = e12 - mu1mu2
        num = (2.0 * mu1mu2 + SSIM_C1) * (2.0 * s12 + SSIM_C2)
        den = (mu1sq + mu2sq + SSIM_C1) * (s1 + s2 + SSIM_C2)
        return jnp.sum(num / den) * inv_chw

    # ---- single batched Gaussian-filter matmul over every plane we need ----
    # order: [o0, o1, o2, t, o0^2, o1^2, o2^2, t^2, o0*t, o1*t, o2*t (, o0*o1, o0*o2, o1*o2)]
    parts = [o0, o1, o2, tg,
             o0 * o0, o1 * o1, o2 * o2, tg * tg,
             o0 * tg, o1 * tg, o2 * tg]
    if epoch >= 5:
        parts += [o0 * o1, o0 * o2, o1 * o2]
    n = len(parts)
    stack = jnp.stack(parts, axis=0)                   # (n, Bs, C, HW)
    f = jnp.dot(stack.reshape(n * Bs * C, HW), K,
                preferred_element_type=jnp.float32)    # one (M, HW) @ (HW, HW) MXU matmul
    f = f.reshape(n, Bs, C, HW)
    mu0, mu1, mu2, mut = f[0], f[1], f[2], f[3]        # means
    e20, e21, e22, e2t = f[4], f[5], f[6], f[7]        # E[x^2]
    ex0t, ex1t, ex2t = f[8], f[9], f[10]               # E[o_k * t]

    # ---- TV loss on the flattened lane-dense layout ----
    x = o.reshape(Bs, 3 * C, HW)
    count_h = float(C * (H - 1) * W)
    count_w = float(C * H * (W - 1))
    dh = x[:, :, W:] - x[:, :, :HW - W]                # every lane pair is a valid H-diff
    h_tv = jnp.sum(dh * dh)
    dw = x[:, :, 1:] - x[:, :, :HW - 1]                # includes row-wrap diffs -> mask them
    lane = lax.broadcasted_iota(jnp.int32, dw.shape, 2)
    dw = jnp.where((lane % W) != (W - 1), dw, 0.0)
    w_tv = jnp.sum(dw * dw)
    tv = 2.0 * (h_tv / count_h + w_tv / count_w) / 3.0   # summed across samples (linear)

    total = (mse_sum(o0, tg) + mse_sum(o1, tg) + mse_sum(o2, tg)
             + 1e-4 * tv
             + 3.0 * Bs
             - (ssim_sum(mu0, mut, e20, e2t, ex0t)
                + ssim_sum(mu1, mut, e21, e2t, ex1t)
                + ssim_sum(mu2, mut, e22, e2t, ex2t)))

    if epoch >= 5:                                      # static specialization, no pl.when
        ex01, ex02, ex12 = f[11], f[12], f[13]          # E[o_j * o_k]
        total = total + (mse_sum(o0, o1) + mse_sum(o0, o2) + mse_sum(o1, o2)
                         + 3.0 * Bs
                         - (ssim_sum(mu0, mu1, e20, e21, ex01)
                            + ssim_sum(mu0, mu2, e20, e22, ex02)
                            + ssim_sum(mu1, mu2, e21, e22, ex12)))

    loss_ref[...] = jnp.zeros_like(loss_ref) + total


def multi_loss_ssim_improved(output, target, epoch):
    """Pallas implementation of Multi_loss_ssim_improved.forward (epoch is static)."""
    out_n, C, H, W = output.shape
    B = target.shape[0]
    assert out_n == 3 * B, "output must have 3 * batch_size images"
    HW = H * W
    if HW > 2048:
        # TODO(synk): fall back to a lane-packed block-diagonal separable filter for large H*W
        # (dense kron(mh, mw) is (HW)^2 f32 and would blow v7x's 64 MiB VMEM at 64x64+).
        raise NotImplementedError("dense kron Gaussian filter is gated to H*W <= 2048")

    epoch = int(epoch)
    mh = _band_matrix(H)
    mw = _band_matrix(W)
    K = jnp.asarray(np.kron(mh, mw))                    # (HW, HW), symmetric

    # Two parallel steps when B is even (one per v7x TensorCore), else one folded step.
    G = 2 if (B >= 2 and B % 2 == 0) else 1
    Bs = B // G

    out_r = output.reshape(G, Bs * 3 * C, HW)
    tgt_r = target.reshape(G, Bs * C, HW)

    n_planes = 14 if epoch >= 5 else 11
    vmem_est = 4 * (2 * (Bs * 4 * C * HW) + 2 * HW * HW + 6 * n_planes * Bs * C * HW)
    vmem_limit = int(min(max(vmem_est, 4 * 1024 * 1024), 96 * 1024 * 1024))

    kern = functools.partial(_loss_kernel, C=C, H=H, W=W, Bs=Bs, epoch=epoch)

    per_step = pl.pallas_call(
        kern,
        out_shape=jax.ShapeDtypeStruct((G, 1, 1), jnp.float32),
        grid=(G,),
        in_specs=[
            pl.BlockSpec((1, Bs * 3 * C, HW), lambda i: (i, 0, 0)),
            pl.BlockSpec((1, Bs * C, HW), lambda i: (i, 0, 0)),
            pl.BlockSpec((HW, HW), lambda i: (0, 0)),
        ],
        out_specs=pl.BlockSpec((1, 1, 1), lambda i: (i, 0, 0)),
        compiler_params=pltpu.CompilerParams(
            dimension_semantics=("parallel",) if G > 1 else ("arbitrary",),
            vmem_limit_bytes=vmem_limit,
        ),
    )(out_r, tgt_r, K)

    return jnp.sum(per_step) / B


# -------------------- pure-JAX reference (for validation) --------------------
def _reference_loss(output, target, epoch, C, H, W):
    mh = jnp.asarray(_band_matrix(H))
    mw = jnp.asarray(_band_matrix(W))

    def gf(x):  # (C,H,W)
        y = jnp.einsum('chv,vw->chw', x, mw)
        return jnp.einsum('hv,cvw->chw', mh, y)

    def ssim(x, y):
        mu1, mu2 = gf(x), gf(y)
        s1 = gf(x * x) - mu1 * mu1
        s2 = gf(y * y) - mu2 * mu2
        s12 = gf(x * y) - mu1 * mu2
        m = ((2 * mu1 * mu2 + SSIM_C1) * (2 * s12 + SSIM_C2)) / \
            ((mu1 * mu1 + mu2 * mu2 + SSIM_C1) * (s1 + s2 + SSIM_C2))
        return jnp.mean(m)

    def mse(a, b):
        return jnp.mean((a - b) ** 2)

    B = target.shape[0]
    loss = 0.0
    for i in range(B):
        o0, o1, o2 = output[3 * i], output[3 * i + 1], output[3 * i + 2]
        tg = target[i]
        o = output[3 * i:3 * i + 3]
        count_h = C * (H - 1) * W
        count_w = C * H * (W - 1)
        h_tv = jnp.sum((o[:, :, 1:, :] - o[:, :, :-1, :]) ** 2)
        w_tv = jnp.sum((o[:, :, :, 1:] - o[:, :, :, :-1]) ** 2)
        tv = 2.0 * (h_tv / count_h + w_tv / count_w) / 3.0
        l = (mse(o0, tg) + mse(o1, tg) + mse(o2, tg) + 1e-4 * tv
             + (1 - ssim(o0, tg)) + (1 - ssim(o1, tg)) + (1 - ssim(o2, tg)))
        if epoch >= 5:
            l = l + (mse(o0, o1) + mse(o0, o2) + mse(o1, o2)
                     + (1 - ssim(o0, o1)) + (1 - ssim(o0, o2)) + (1 - ssim(o1, o2)))
        loss = loss + l
    return loss / B


if __name__ == "__main__":
    B, C, H, W = 2, 4, 16, 16
    key = jax.random.PRNGKey(0)
    k1, k2 = jax.random.split(key)
    output = jax.random.uniform(k1, (3 * B, C, H, W), dtype=jnp.float32)
    target = jax.random.uniform(k2, (B, C, H, W), dtype=jnp.float32)

    for epoch in (2, 7):  # exercise both static specializations (epoch < 5 and epoch >= 5)
        got = jax.block_until_ready(multi_loss_ssim_improved(output, target, epoch))
        ref = jax.block_until_ready(_reference_loss(output, target, epoch, C, H, W))
        np.testing.assert_allclose(np.asarray(got), np.asarray(ref),
                                   rtol=2e-5, atol=2e-5)

    print("KERNEL_OK")
</pallas_src>

<mosaic_0001>
module attributes {stable_mosaic.version = 11 : i64} {
  func.func @_loss_kernel(%arg0: i32, %arg1: memref<1x12x256xf32, #tpu.memory_space<vmem>>, %arg2: memref<1x4x256xf32, #tpu.memory_space<vmem>>, %arg3: memref<256x256xf32, #tpu.memory_space<vmem>>, %arg4: memref<1x1x1xf32, #tpu.memory_space<vmem>>) attributes {dimension_semantics = [#tpu.dimension_semantics<parallel>], iteration_bounds = array<i64: 2>, scalar_prefetch = 0 : i64, scratch_operands = 0 : i64, tpu.core_type = #tpu.core_type<tc>, window_params = [{transform_indices = @transform_0, window_bounds = array<i64: 1, 12, 256>}, {transform_indices = @transform_1, window_bounds = array<i64: 1, 4, 256>}, {pipeline_mode = #tpu.pipeline_mode<synchronous>, transform_indices = @transform_2, window_bounds = array<i64: 256, 256>}, {transform_indices = @transform_3, window_bounds = array<i64: 1, 1, 1>}]} {
    %c0 = arith.constant 0 : index
    %c0_0 = arith.constant 0 : index
    %0 = vector.load %arg3[%c0, %c0_0] : memref<256x256xf32, #tpu.memory_space<vmem>>, vector<256x256xf32>
    %c0_1 = arith.constant 0 : index
    %c0_2 = arith.constant 0 : index
    %c0_3 = arith.constant 0 : index
    %1 = vector.load %arg1[%c0_1, %c0_2, %c0_3] : memref<1x12x256xf32, #tpu.memory_space<vmem>>, vector<1x12x256xf32>
    %2 = vector.shape_cast %1 : vector<1x12x256xf32> to vector<1x3x4x256xf32>
    %c0_4 = arith.constant 0 : index
    %c0_5 = arith.constant 0 : index
    %c0_6 = arith.constant 0 : index
    %3 = vector.load %arg2[%c0_4, %c0_5, %c0_6] : memref<1x4x256xf32, #tpu.memory_space<vmem>>, vector<1x4x256xf32>
    %4 = vector.extract_strided_slice %2 {offsets = [0, 0, 0, 0], sizes = [1, 1, 4, 256], strides = [1, 1, 1, 1]} : vector<1x3x4x256xf32> to vector<1x1x4x256xf32>
    %5 = vector.shape_cast %4 : vector<1x1x4x256xf32> to vector<1x4x256xf32>
    %6 = vector.extract_strided_slice %2 {offsets = [0, 1, 0, 0], sizes = [1, 1, 4, 256], strides = [1, 1, 1, 1]} : vector<1x3x4x256xf32> to vector<1x1x4x256xf32>
    %7 = vector.shape_cast %6 : vector<1x1x4x256xf32> to vector<1x4x256xf32>
    %8 = vector.extract_strided_slice %2 {offsets = [0, 2, 0, 0], sizes = [1, 1, 4, 256], strides = [1, 1, 1, 1]} : vector<1x3x4x256xf32> to vector<1x1x4x256xf32>
    %9 = vector.shape_cast %8 : vector<1x1x4x256xf32> to vector<1x4x256xf32>
    %10 = arith.mulf %5, %5 : vector<1x4x256xf32>
    %11 = arith.mulf %7, %7 : vector<1x4x256xf32>
    %12 = arith.mulf %9, %9 : vector<1x4x256xf32>
    %13 = arith.mulf %3, %3 : vector<1x4x256xf32>
    %14 = arith.mulf %5, %3 : vector<1x4x256xf32>
    %15 = arith.mulf %7, %3 : vector<1x4x256xf32>
    %16 = arith.mulf %9, %3 : vector<1x4x256xf32>
    %17 = vector.shape_cast %5 : vector<1x4x256xf32> to vector<1x1x4x256xf32>
    %18 = vector.shape_cast %7 : vector<1x4x256xf32> to vector<1x1x4x256xf32>
    %19 = vector.shape_cast %9 : vector<1x4x256xf32> to vector<1x1x4x256xf32>
    %20 = vector.shape_cast %3 : vector<1x4x256xf32> to vector<1x1x4x256xf32>
    %21 = vector.shape_cast %10 : vector<1x4x256xf32> to vector<1x1x4x256xf32>
    %22 = vector.shape_cast %11 : vector<1x4x256xf32> to vector<1x1x4x256xf32>
    %23 = vector.shape_cast %12 : vector<1x4x256xf32> to vector<1x1x4x256xf32>
    %24 = vector.shape_cast %13 : vector<1x4x256xf32> to vector<1x1x4x256xf32>
    %25 = vector.shape_cast %14 : vector<1x4x256xf32> to vector<1x1x4x256xf32>
    %26 = vector.shape_cast %15 : vector<1x4x256xf32> to vector<1x1x4x256xf32>
    %27 = vector.shape_cast %16 : vector<1x4x256xf32> to vector<1x1x4x256xf32>
    %28 = tpu.concatenate %17, %18, %19, %20, %21, %22, %23, %24, %25, %26, %27 in 0 : vector<1x1x4x256xf32>, vector<1x1x4x256xf32>, vector<1x1x4x256xf32>, vector<1x1x4x256xf32>, vector<1x1x4x256xf32>, vector<1x1x4x256xf32>, vector<1x1x4x256xf32>, vector<1x1x4x256xf32>, vector<1x1x4x256xf32>, vector<1x1x4x256xf32>, vector<1x1x4x256xf32> -> vector<11x1x4x256xf32>
    %29 = vector.shape_cast %28 : vector<11x1x4x256xf32> to vector<44x256xf32>
    %cst = arith.constant dense<0.000000e+00> : vector<44x256xf32>
    %30 = tpu.matmul %29, %0, %cst {dimension_numbers = #tpu.dot_dimension_numbers<[1], [0], [0], [1], [0, 0, 1, 1], [], []>} : vector<44x256xf32>, vector<256x256xf32>, vector<44x256xf32> -> vector<44x256xf32>
    %31 = vector.shape_cast %30 : vector<44x256xf32> to vector<11x1x4x256xf32>
    %32 = vector.extract_strided_slice %31 {offsets = [0, 0, 0, 0], sizes = [1, 1, 4, 256], strides = [1, 1, 1, 1]} : vector<11x1x4x256xf32> to vector<1x1x4x256xf32>
    %33 = vector.shape_cast %32 : vector<1x1x4x256xf32> to vector<1x4x256xf32>
    %34 = vector.extract_strided_slice %31 {offsets = [1, 0, 0, 0], sizes = [1, 1, 4, 256], strides = [1, 1, 1, 1]} : vector<11x1x4x256xf32> to vector<1x1x4x256xf32>
    %35 = vector.shape_cast %34 : vector<1x1x4x256xf32> to vector<1x4x256xf32>
    %36 = vector.extract_strided_slice %31 {offsets = [2, 0, 0, 0], sizes = [1, 1, 4, 256], strides = [1, 1, 1, 1]} : vector<11x1x4x256xf32> to vector<1x1x4x256xf32>
    %37 = vector.shape_cast %36 : vector<1x1x4x256xf32> to vector<1x4x256xf32>
    %38 = vector.extract_strided_slice %31 {offsets = [3, 0, 0, 0], sizes = [1, 1, 4, 256], strides = [1, 1, 1, 1]} : vector<11x1x4x256xf32> to vector<1x1x4x256xf32>
    %39 = vector.shape_cast %38 : vector<1x1x4x256xf32> to vector<1x4x256xf32>
    %40 = vector.extract_strided_slice %31 {offsets = [4, 0, 0, 0], sizes = [1, 1, 4, 256], strides = [1, 1, 1, 1]} : vector<11x1x4x256xf32> to vector<1x1x4x256xf32>
    %41 = vector.shape_cast %40 : vector<1x1x4x256xf32> to vector<1x4x256xf32>
    %42 = vector.extract_strided_slice %31 {offsets = [5, 0, 0, 0], sizes = [1, 1, 4, 256], strides = [1, 1, 1, 1]} : vector<11x1x4x256xf32> to vector<1x1x4x256xf32>
    %43 = vector.shape_cast %42 : vector<1x1x4x256xf32> to vector<1x4x256xf32>
    %44 = vector.extract_strided_slice %31 {offsets = [6, 0, 0, 0], sizes = [1, 1, 4, 256], strides = [1, 1, 1, 1]} : vector<11x1x4x256xf32> to vector<1x1x4x256xf32>
    %45 = vector.shape_cast %44 : vector<1x1x4x256xf32> to vector<1x4x256xf32>
    %46 = vector.extract_strided_slice %31 {offsets = [7, 0, 0, 0], sizes = [1, 1, 4, 256], strides = [1, 1, 1, 1]} : vector<11x1x4x256xf32> to vector<1x1x4x256xf32>
    %47 = vector.shape_cast %46 : vector<1x1x4x256xf32> to vector<1x4x256xf32>
    %48 = vector.extract_strided_slice %31 {offsets = [8, 0, 0, 0], sizes = [1, 1, 4, 256], strides = [1, 1, 1, 1]} : vector<11x1x4x256xf32> to vector<1x1x4x256xf32>
    %49 = vector.shape_cast %48 : vector<1x1x4x256xf32> to vector<1x4x256xf32>
    %50 = vector.extract_strided_slice %31 {offsets = [9, 0, 0, 0], sizes = [1, 1, 4, 256], strides = [1, 1, 1, 1]} : vector<11x1x4x256xf32> to vector<1x1x4x256xf32>
    %51 = vector.shape_cast %50 : vector<1x1x4x256xf32> to vector<1x4x256xf32>
    %52 = vector.extract_strided_slice %31 {offsets = [10, 0, 0, 0], sizes = [1, 1, 4, 256], strides = [1, 1, 1, 1]} : vector<11x1x4x256xf32> to vector<1x1x4x256xf32>
    %53 = vector.shape_cast %52 : vector<1x1x4x256xf32> to vector<1x4x256xf32>
    %54 = vector.shape_cast %2 : vector<1x3x4x256xf32> to vector<1x12x256xf32>
    %55 = vector.extract_strided_slice %54 {offsets = [0, 0, 16], sizes = [1, 12, 240], strides = [1, 1, 1]} : vector<1x12x256xf32> to vector<1x12x240xf32>
    %56 = vector.extract_strided_slice %54 {offsets = [0, 0, 0], sizes = [1, 12, 240], strides = [1, 1, 1]} : vector<1x12x256xf32> to vector<1x12x240xf32>
    %57 = arith.subf %55, %56 : vector<1x12x240xf32>
    %58 = arith.mulf %57, %57 : vector<1x12x240xf32>
    %59 = vector.shape_cast %58 : vector<1x12x240xf32> to vector<1x1x12x240xf32>
    %cst_7 = arith.constant dense<0.000000e+00> : vector<1xf32>
    %60 = vector.multi_reduction <add>, %59, %cst_7 [1, 2, 3] : vector<1x1x12x240xf32> to vector<1xf32>
    %61 = vector.shape_cast %60 : vector<1xf32> to vector<1x1x1x1xf32>
    %62 = vector.extract %61[0, 0, 0, 0] : f32 from vector<1x1x1x1xf32>
    %63 = vector.extract_strided_slice %54 {offsets = [0, 0, 1], sizes = [1, 12, 255], strides = [1, 1, 1]} : vector<1x12x256xf32> to vector<1x12x255xf32>
    %64 = vector.extract_strided_slice %54 {offsets = [0, 0, 0], sizes = [1, 12, 255], strides = [1, 1, 1]} : vector<1x12x256xf32> to vector<1x12x255xf32>
    %65 = arith.subf %63, %64 : vector<1x12x255xf32>
    %66 = tpu.iota {dimensions = array<i32: 2>} : vector<1x12x255xi32>
    %c16_i32 = arith.constant 16 : i32
    %c0_i32 = arith.constant 0 : i32
    %67 = arith.cmpi eq, %c16_i32, %c0_i32 : i32
    %c1_i32 = arith.constant 1 : i32
    %68 = arith.select %67, %c1_i32, %c16_i32 : i32
    %69 = vector.broadcast %68 : i32 to vector<1x12x255xi32>
    %70 = arith.remsi %66, %69 : vector<1x12x255xi32>
    %c0_i32_8 = arith.constant 0 : i32
    %71 = vector.broadcast %c0_i32_8 : i32 to vector<1x12x255xi32>
    %72 = arith.cmpi ne, %70, %71 : vector<1x12x255xi32>
    %c0_i32_9 = arith.constant 0 : i32
    %73 = vector.broadcast %c0_i32_9 : i32 to vector<1x12x255xi32>
    %74 = arith.cmpi slt, %70, %73 : vector<1x12x255xi32>
    %c0_i32_10 = arith.constant 0 : i32
    %75 = arith.cmpi slt, %68, %c0_i32_10 : i32
    %76 = vector.broadcast %75 : i1 to vector<1x12x255xi1>
    %77 = vector.broadcast %76 : vector<1x12x255xi1> to vector<1x12x255xi1>
    %78 = arith.xori %74, %77 : vector<1x12x255xi1>
    %79 = arith.andi %78, %72 : vector<1x12x255xi1>
    %80 = vector.broadcast %68 : i32 to vector<1x12x255xi32>
    %81 = arith.addi %70, %80 : vector<1x12x255xi32>
    %82 = arith.select %79, %81, %70 : vector<1x12x255xi1>, vector<1x12x255xi32>
    %c15_i32 = arith.constant 15 : i32
    %83 = vector.broadcast %c15_i32 : i32 to vector<1x12x255xi32>
    %84 = arith.cmpi ne, %82, %83 : vector<1x12x255xi32>
    %cst_11 = arith.constant 0.000000e+00 : f32
    %85 = vector.broadcast %cst_11 : f32 to vector<1x12x255xf32>
    %86 = arith.select %84, %65, %85 : vector<1x12x255xi1>, vector<1x12x255xf32>
    %87 = arith.mulf %86, %86 : vector<1x12x255xf32>
    %88 = vector.shape_cast %87 : vector<1x12x255xf32> to vector<1x1x12x255xf32>
    %cst_12 = arith.constant dense<0.000000e+00> : vector<1xf32>
    %89 = vector.multi_reduction <add>, %88, %cst_12 [1, 2, 3] : vector<1x1x12x255xf32> to vector<1xf32>
    %90 = vector.shape_cast %89 : vector<1xf32> to vector<1x1x1x1xf32>
    %91 = vector.extract %90[0, 0, 0, 0] : f32 from vector<1x1x1x1xf32>
    %cst_13 = arith.constant 9.600000e+02 : f32
    %92 = arith.divf %62, %cst_13 : f32
    %cst_14 = arith.constant 9.600000e+02 : f32
    %93 = arith.divf %91, %cst_14 : f32
    %94 = arith.addf %92, %93 : f32
    %cst_15 = arith.constant 2.000000e+00 : f32
    %95 = arith.mulf %cst_15, %94 : f32
    %cst_16 = arith.constant 3.000000e+00 : f32
    %96 = arith.divf %95, %cst_16 : f32
    %97 = arith.subf %5, %3 : vector<1x4x256xf32>
    %98 = arith.mulf %97, %97 : vector<1x4x256xf32>
    %99 = vector.shape_cast %98 : vector<1x4x256xf32> to vector<1x1x4x256xf32>
    %cst_17 = arith.constant dense<0.000000e+00> : vector<1xf32>
    %100 = vector.multi_reduction <add>, %99, %cst_17 [1, 2, 3] : vector<1x1x4x256xf32> to vector<1xf32>
    %101 = vector.shape_cast %100 : vector<1xf32> to vector<1x1x1x1xf32>
    %102 = vector.extract %101[0, 0, 0, 0] : f32 from vector<1x1x1x1xf32>
    %cst_18 = arith.constant 9.765625E-4 : f32
    %103 = arith.mulf %102, %cst_18 : f32
    %104 = arith.subf %7, %3 : vector<1x4x256xf32>
    %105 = arith.mulf %104, %104 : vector<1x4x256xf32>
    %106 = vector.shape_cast %105 : vector<1x4x256xf32> to vector<1x1x4x256xf32>
    %cst_19 = arith.constant dense<0.000000e+00> : vector<1xf32>
    %107 = vector.multi_reduction <add>, %106, %cst_19 [1, 2, 3] : vector<1x1x4x256xf32> to vector<1xf32>
    %108 = vector.shape_cast %107 : vector<1xf32> to vector<1x1x1x1xf32>
    %109 = vector.extract %108[0, 0, 0, 0] : f32 from vector<1x1x1x1xf32>
    %cst_20 = arith.constant 9.765625E-4 : f32
    %110 = arith.mulf %109, %cst_20 : f32
    %111 = arith.addf %103, %110 : f32
    %112 = arith.subf %9, %3 : vector<1x4x256xf32>
    %113 = arith.mulf %112, %112 : vector<1x4x256xf32>
    %114 = vector.shape_cast %113 : vector<1x4x256xf32> to vector<1x1x4x256xf32>
    %cst_21 = arith.constant dense<0.000000e+00> : vector<1xf32>
    %115 = vector.multi_reduction <add>, %114, %cst_21 [1, 2, 3] : vector<1x1x4x256xf32> to vector<1xf32>
    %116 = vector.shape_cast %115 : vector<1xf32> to vector<1x1x1x1xf32>
    %117 = vector.extract %116[0, 0, 0, 0] : f32 from vector<1x1x1x1xf32>
    %cst_22 = arith.constant 9.765625E-4 : f32
    %118 = arith.mulf %117, %cst_22 : f32
    %119 = arith.addf %111, %118 : f32
    %cst_23 = arith.constant 9.99999974E-5 : f32
    %120 = arith.mulf %cst_23, %96 : f32
    %121 = arith.addf %119, %120 : f32
    %cst_24 = arith.constant 3.000000e+00 : f32
    %122 = arith.addf %121, %cst_24 : f32
    %123 = arith.mulf %33, %39 : vector<1x4x256xf32>
    %124 = arith.mulf %33, %33 : vector<1x4x256xf32>
    %125 = arith.mulf %39, %39 : vector<1x4x256xf32>
    %126 = arith.subf %41, %124 : vector<1x4x256xf32>
    %127 = arith.subf %47, %125 : vector<1x4x256xf32>
    %128 = arith.subf %49, %123 : vector<1x4x256xf32>
    %cst_25 = arith.constant 2.000000e+00 : f32
    %129 = vector.broadcast %cst_25 : f32 to vector<1x4x256xf32>
    %130 = arith.mulf %129, %123 : vector<1x4x256xf32>
    %cst_26 = arith.constant 9.99999974E-5 : f32
    %131 = vector.broadcast %cst_26 : f32 to vector<1x4x256xf32>
    %132 = arith.addf %130, %131 : vector<1x4x256xf32>
    %cst_27 = arith.constant 2.000000e+00 : f32
    %133 = vector.broadcast %cst_27 : f32 to vector<1x4x256xf32>
    %134 = arith.mulf %133, %128 : vector<1x4x256xf32>
    %cst_28 = arith.constant 8.99999984E-4 : f32
    %135 = vector.broadcast %cst_28 : f32 to vector<1x4x256xf32>
    %136 = arith.addf %134, %135 : vector<1x4x256xf32>
    %137 = arith.mulf %132, %136 : vector<1x4x256xf32>
    %138 = arith.addf %124, %125 : vector<1x4x256xf32>
    %cst_29 = arith.constant 9.99999974E-5 : f32
    %139 = vector.broadcast %cst_29 : f32 to vector<1x4x256xf32>
    %140 = arith.addf %138, %139 : vector<1x4x256xf32>
    %141 = arith.addf %126, %127 : vector<1x4x256xf32>
    %cst_30 = arith.constant 8.99999984E-4 : f32
    %142 = vector.broadcast %cst_30 : f32 to vector<1x4x256xf32>
    %143 = arith.addf %141, %142 : vector<1x4x256xf32>
    %144 = arith.mulf %140, %143 : vector<1x4x256xf32>
    %145 = arith.divf %137, %144 : vector<1x4x256xf32>
    %146 = vector.shape_cast %145 : vector<1x4x256xf32> to vector<1x1x4x256xf32>
    %cst_31 = arith.constant dense<0.000000e+00> : vector<1xf32>
    %147 = vector.multi_reduction <add>, %146, %cst_31 [1, 2, 3] : vector<1x1x4x256xf32> to vector<1xf32>
    %148 = vector.shape_cast %147 : vector<1xf32> to vector<1x1x1x1xf32>
    %149 = vector.extract %148[0, 0, 0, 0] : f32 from vector<1x1x1x1xf32>
    %cst_32 = arith.constant 9.765625E-4 : f32
    %150 = arith.mulf %149, %cst_32 : f32
    %151 = arith.mulf %35, %39 : vector<1x4x256xf32>
    %152 = arith.mulf %35, %35 : vector<1x4x256xf32>
    %153 = arith.mulf %39, %39 : vector<1x4x256xf32>
    %154 = arith.subf %43, %152 : vector<1x4x256xf32>
    %155 = arith.subf %47, %153 : vector<1x4x256xf32>
    %156 = arith.subf %51, %151 : vector<1x4x256xf32>
    %cst_33 = arith.constant 2.000000e+00 : f32
    %157 = vector.broadcast %cst_33 : f32 to vector<1x4x256xf32>
    %158 = arith.mulf %157, %151 : vector<1x4x256xf32>
    %cst_34 = arith.constant 9.99999974E-5 : f32
    %159 = vector.broadcast %cst_34 : f32 to vector<1x4x256xf32>
    %160 = arith.addf %158, %159 : vector<1x4x256xf32>
    %cst_35 = arith.constant 2.000000e+00 : f32
    %161 = vector.broadcast %cst_35 : f32 to vector<1x4x256xf32>
    %162 = arith.mulf %161, %156 : vector<1x4x256xf32>
    %cst_36 = arith.constant 8.99999984E-4 : f32
    %163 = vector.broadcast %cst_36 : f32 to vector<1x4x256xf32>
    %164 = arith.addf %162, %163 : vector<1x4x256xf32>
    %165 = arith.mulf %160, %164 : vector<1x4x256xf32>
    %166 = arith.addf %152, %153 : vector<1x4x256xf32>
    %cst_37 = arith.constant 9.99999974E-5 : f32
    %167 = vector.broadcast %cst_37 : f32 to vector<1x4x256xf32>
    %168 = arith.addf %166, %167 : vector<1x4x256xf32>
    %169 = arith.addf %154, %155 : vector<1x4x256xf32>
    %cst_38 = arith.constant 8.99999984E-4 : f32
    %170 = vector.broadcast %cst_38 : f32 to vector<1x4x256xf32>
    %171 = arith.addf %169, %170 : vector<1x4x256xf32>
    %172 = arith.mulf %168, %171 : vector<1x4x256xf32>
    %173 = arith.divf %165, %172 : vector<1x4x256xf32>
    %174 = vector.shape_cast %173 : vector<1x4x256xf32> to vector<1x1x4x256xf32>
    %cst_39 = arith.constant dense<0.000000e+00> : vector<1xf32>
    %175 = vector.multi_reduction <add>, %174, %cst_39 [1, 2, 3] : vector<1x1x4x256xf32> to vector<1xf32>
    %176 = vector.shape_cast %175 : vector<1xf32> to vector<1x1x1x1xf32>
    %177 = vector.extract %176[0, 0, 0, 0] : f32 from vector<1x1x1x1xf32>
    %cst_40 = arith.constant 9.765625E-4 : f32
    %178 = arith.mulf %177, %cst_40 : f32
    %179 = arith.addf %150, %178 : f32
    %180 = arith.mulf %37, %39 : vector<1x4x256xf32>
    %181 = arith.mulf %37, %37 : vector<1x4x256xf32>
    %182 = arith.mulf %39, %39 : vector<1x4x256xf32>
    %183 = arith.subf %45, %181 : vector<1x4x256xf32>
    %184 = arith.subf %47, %182 : vector<1x4x256xf32>
    %185 = arith.subf %53, %180 : vector<1x4x256xf32>
    %cst_41 = arith.constant 2.000000e+00 : f32
    %186 = vector.broadcast %cst_41 : f32 to vector<1x4x256xf32>
    %187 = arith.mulf %186, %180 : vector<1x4x256xf32>
    %cst_42 = arith.constant 9.99999974E-5 : f32
    %188 = vector.broadcast %cst_42 : f32 to vector<1x4x256xf32>
    %189 = arith.addf %187, %188 : vector<1x4x256xf32>
    %cst_43 = arith.constant 2.000000e+00 : f32
    %190 = vector.broadcast %cst_43 : f32 to vector<1x4x256xf32>
    %191 = arith.mulf %190, %185 : vector<1x4x256xf32>
    %cst_44 = arith.constant 8.99999984E-4 : f32
    %192 = vector.broadcast %cst_44 : f32 to vector<1x4x256xf32>
    %193 = arith.addf %191, %192 : vector<1x4x256xf32>
    %194 = arith.mulf %189, %193 : vector<1x4x256xf32>
    %195 = arith.addf %181, %182 : vector<1x4x256xf32>
    %cst_45 = arith.constant 9.99999974E-5 : f32
    %196 = vector.broadcast %cst_45 : f32 to vector<1x4x256xf32>
    %197 = arith.addf %195, %196 : vector<1x4x256xf32>
    %198 = arith.addf %183, %184 : vector<1x4x256xf32>
    %cst_46 = arith.constant 8.99999984E-4 : f32
    %199 = vector.broadcast %cst_46 : f32 to vector<1x4x256xf32>
    %200 = arith.addf %198, %199 : vector<1x4x256xf32>
    %201 = arith.mulf %197, %200 : vector<1x4x256xf32>
    %202 = arith.divf %194, %201 : vector<1x4x256xf32>
    %203 = vector.shape_cast %202 : vector<1x4x256xf32> to vector<1x1x4x256xf32>
    %cst_47 = arith.constant dense<0.000000e+00> : vector<1xf32>
    %204 = vector.multi_reduction <add>, %203, %cst_47 [1, 2, 3] : vector<1x1x4x256xf32> to vector<1xf32>
    %205 = vector.shape_cast %204 : vector<1xf32> to vector<1x1x1x1xf32>
    %206 = vector.extract %205[0, 0, 0, 0] : f32 from vector<1x1x1x1xf32>
    %cst_48 = arith.constant 9.765625E-4 : f32
    %207 = arith.mulf %206, %cst_48 : f32
    %208 = arith.addf %179, %207 : f32
    %209 = arith.subf %122, %208 : f32
    %cst_49 = arith.constant 0.000000e+00 : f32
    %210 = vector.broadcast %cst_49 : f32 to vector<1x1x1xf32>
    %211 = vector.broadcast %209 : f32 to vector<1x1x1xf32>
    %212 = arith.addf %210, %211 : vector<1x1x1xf32>
    %c0_50 = arith.constant 0 : index
    %c0_51 = arith.constant 0 : index
    %c0_52 = arith.constant 0 : index
    %213 = vector.load %arg4[%c0_50, %c0_51, %c0_52] : memref<1x1x1xf32, #tpu.memory_space<vmem>>, vector<1x1x1xf32>
    tpu.vector_store %arg4[%c0_50, %c0_51, %c0_52], %212 {strides = array<i32>} : memref<1x1x1xf32, #tpu.memory_space<vmem>>, vector<1x1x1xf32>,
    return
  }
  func.func @transform_0(%arg0: i32) -> (i32, i32, i32) {
    %c0_i32 = arith.constant 0 : i32
    %c0_i32_0 = arith.constant 0 : i32
    %c0_i32_1 = arith.constant 0 : i32
    return %arg0, %c0_i32, %c0_i32_0 : i32, i32, i32
  }
  func.func @transform_1(%arg0: i32) -> (i32, i32, i32) {
    %c0_i32 = arith.constant 0 : i32
    %c0_i32_0 = arith.constant 0 : i32
    %c0_i32_1 = arith.constant 0 : i32
    return %arg0, %c0_i32, %c0_i32_0 : i32, i32, i32
  }
  func.func @transform_2(%arg0: i32) -> (i32, i32) {
    %c0_i32 = arith.constant 0 : i32
    %c0_i32_0 = arith.constant 0 : i32
    %c0_i32_1 = arith.constant 0 : i32
    return %c0_i32, %c0_i32_0 : i32, i32
  }
  func.func @transform_3(%arg0: i32) -> (i32, i32, i32) {
    %c0_i32 = arith.constant 0 : i32
    %c0_i32_0 = arith.constant 0 : i32
    %c0_i32_1 = arith.constant 0 : i32
    return %arg0, %c0_i32, %c0_i32_0 : i32, i32, i32
  }
}

</mosaic_0001>

<bundles_post_ra>
// kernel: tpu_custom_call.1
= control target key start
LH: loop header
LB: loop body
LE: loop exit
PB: predicated region body
PF: predicated region fallthrough
CT: control target
= control target key end

     0   :  { %8 = vsyncpa [#allocation3], 0  ;;  %s1142_s12 = smov 0   ;;  %s1362_s0 = inlined_call_operand.vmem [shape: f32[2,12,256], index: 0, kind: input, shape index: {}]   ;;  %s1363_s1 = inlined_call_operand.vmem [shape: f32[2,4,256], index: 1, kind: input, shape index: {}]   ;;  %s1364_s2 = inlined_call_operand.hbm [shape: f32[256,256], index: 2, kind: input, shape index: {}]   ;;  %s1365_s3 = inlined_call_operand.vmem [shape: f32[2,1,1], index: 3, kind: output, shape index: {}]  }
   0x1 LB: > { %s129_s15 = sshll.u32 %s1364_s2, 4  ;;  %s999_s16 = sadd.s32 4294967295, %s1111_s12   ;;  %s1111_s12 = sphi %s1142_s12, %s14_s12   ;;  %s130_s15 = int_to_ptr.hbm [resolvable:$true] %s129_s15 }
   0x2   : > { %p1001_p0 = scmp.ge.s32.totalorder %s1111_s12, 1  ;;  %p118_p1 = scmp.lt.s32.totalorder %s1111_s12, 3 }
   0x3   : > { %p1042_p2 = scmp.eq.s32.totalorder %s999_s16, 0  ;;  %s1113_s17 = smov [#allocation2]  }
   0x4   : > { %p119_p3 = pnand %p1001_p0, %p118_p1  ;;  %s131_s18 = sshll.u32 %s1113_s17, 4  ;;  %s132_s18 = int_to_ptr.vmem [resolvable:$true] %s131_s18 }
   0x5   : > { %s1114_s19 = smov 256   ;;  %s1115_s20 = smov 16  }
   0x6   : > { %p1038_p4 = pneg %p119_p3  ;;  %163 = sbr.rel (%p119_p3) target bundleno = 483 (0x1e3), region = 32 }
   0x8   : > { %p1039_p5 = pnand %p1042_p2, %p1038_p4 }
   0xa   : > { %1041 = dma.hbm_to_vmem [thread:$0]  (!%p1039_p5), %s130_s15, 8192, %s132_s18, [#allocation3], %s1114_s19, %s1114_s19, %s1115_s20  }
   0xb   : > { %1106 = dma.done.wait (%p1042_p2), [#allocation3], 8192  }
   0xc   : > { %1108 = vsyncadd (%p1042_p2), [#allocation3], 4294959104  ;;  %p191_p6 = scmp.lt.s32.totalorder %s999_s16, 1  ;;  %v235_v2 = vld [vmem:[#allocation2 + $0xf8] sm:$0xff]  ;;  %s1116_s29 = smov 16   ;;  %v233_v4 = vld [vmem:[#allocation2 + $0xe8] sm:$0xff] }
   0xd   : > { %s1117_s30 = smov 1   ;;  %v267_v3 = vld [vmem:[#allocation2 + $0x1f8] sm:$0xff]  ;;  %v265_v5 = vld [vmem:[#allocation2 + $0x1e8] sm:$0xff]  ;;  %414 = vmatpush.msra.mxu2 %v235_v2  ;;  %vm278_vm0 = vcmask 1043456   ;;  %v234_v9 = vld [vmem:[#allocation2 + $0xf0] sm:$0xff]  ;;  %s1118_s4 = smov 127  }
   0xe   : > { %s1371_s16 = smov (!%p191_p6, %s999_s16), 1  ;;  %449 = vmatpush.msra.mxu3 %v267_v3  ;;  %v231_v6 = vld [vmem:[#allocation2 + $0xd8] sm:$0xff]  ;;  %v266_v11 = vld [vmem:[#allocation2 + $0x1f0] sm:$0xff]  ;;  %v229_v12 = vld [vmem:[#allocation2 + $0xc8] sm:$0xff]  ;;  %344 = vmatpush.msra.mxu0 %v234_v9  ;;  %vm537_vm1 = vcmask 130048   ;;  %vm595_vm2 = vcmask 7168  }
   0xf   : > { %s1012_s21 = sshll.u32 %s1371_s16, 5  ;;  %s1013_s22 = sshll.u32 %s1371_s16, 3  ;;  %v263_v7 = vld [vmem:[#allocation2 + $0x1d8] sm:$0xff]  ;;  %415 = vmatpush.msra.mxu2 %v233_v4  ;;  %v261_v13 = vld [vmem:[#allocation2 + $0x1c8] sm:$0xff]  ;;  %379 = vmatpush.msra.mxu1 %v266_v11  ;;  %v232_v14 = vld [vmem:[#allocation2 + $0xe0] sm:$0xff]  ;;  %vm647_vm15 = vcmask 1039360  }
  0x10   : > { %s1160_s25 = scalar_lea.vmem %s1362_s0, %s1012_s21  ;;  %s200_s28 = scalar_lea.vmem %s1363_s1, %s1013_s22  ;;  %450 = vmatpush.msra.mxu3 %v265_v5  ;;  %v227_v19 = vld [vmem:[#allocation2 + $0xb8] sm:$0xff]  ;;  %345 = vmatpush.msra.mxu0 %v232_v14  ;;  %v264_v21 = vld [vmem:[#allocation2 + $0x1e0] sm:$0xff]  ;;  %v230_v22 = vld [vmem:[#allocation2 + $0xd0] sm:$0xff] }
  0x11   : > { %v1166_v0 = vld [vmem:[%s1160_s25] sm:$0xff]  ;;  %v1176_v8 = vld [vmem:[%s1160_s25 + $0x8] sm:$0xff]  ;;  %416 = vmatpush.msra.mxu2 %v231_v6  ;;  %v225_v24 = vld [vmem:[#allocation2 + $0xa8] sm:$0xff]  ;;  %380 = vmatpush.msra.mxu1 %v264_v21  ;;  %s1119_s5 = smov 112  }
  0x12   : > { %v1168_v1 = vld [vmem:[%s200_s28] sm:$0xff]  ;;  %529 = vrot.lane.b32.xlu1 %v1166_v0, %s1116_s29  ;;  %587 = vrot.lane.b32.xlu0 %v1166_v0, %s1117_s30  ;;  %v276_v10 = vrot.slane %v1176_v8, 4  ;;  %v257_v25 = vld [vmem:[#allocation2 + $0x1a8] sm:$0xff]  ;;  %v262_v27 = vld [vmem:[#allocation2 + $0x1d0] sm:$0xff] }
  0x13   : > { %308 = vst [vmem:[#allocation1 + $0x11] ss:$2 sm:$0xff] %v1168_v1  ;;  %451 = vmatpush.msra.mxu3 %v263_v7  ;;  %v259_v20 = vld [vmem:[#allocation2 + $0x1b8] sm:$0xff]  ;;  %417 = vmatpush.msra.mxu2 %v229_v12  ;;  %v228_v28 = vld [vmem:[#allocation2 + $0xc0] sm:$0xff]  ;;  %v226_v32 = vld [vmem:[#allocation2 + $0xb0] sm:$0xff]  ;;  %v290_v62 = vmul.f32 %v1168_v1, %v1168_v1 }
  0x14   : > { %v1181_v15 = vsel %vm278_vm0, %v1166_v0, %v276_v10  ;;  %v280_v16 = vsel %vm278_vm0, %v276_v10, %v1166_v0  ;;  %346 = vmatpush.msra.mxu0 %v230_v22  ;;  %v223_v29 = vld [vmem:[#allocation2 + $0x98] sm:$0xff]  ;;  %v260_v31 = vld [vmem:[#allocation2 + $0x1c0] sm:$0xff]  ;;  %381 = vmatpush.msra.mxu1 %v262_v27  ;;  %v221_v33 = vld [vmem:[#allocation2 + $0x88] sm:$0xff] }
  0x15   : > { %v281_v17 = vrot.slane %v280_v16, 4  ;;  %v287_v18 = vmul.f32 %v1181_v15, %v1181_v15  ;;  %302 = vst [vmem:[#allocation1] ss:$2 sm:$0xff] %v1181_v15  ;;  %452 = vmatpush.msra.mxu3 %v261_v13  ;;  %418 = vmatpush.msra.mxu2 %v227_v19  ;;  %v255_v30 = vld [vmem:[#allocation2 + $0x198] sm:$0xff]  ;;  %v253_v34 = vld [vmem:[#allocation2 + $0x188] sm:$0xff]  ;;  %v258_v36 = vld [vmem:[#allocation2 + $0x1b0] sm:$0xff]  ;;  %v291_v48 = vmul.f32 %v1168_v1, %v1181_v15 }
  0x16   : > { %347 = vmatpush.msra.mxu0 %v228_v28  ;;  %v1196_v35 = vld [vmem:[%s1160_s25 + $0x18] sm:$0xf]  ;;  %v1199_v37 = vld [vmem:[%s1160_s25 + $0x10] sm:$0xf]  ;;  %382 = vmatpush.msra.mxu1 %v260_v31  ;;  %v219_v39 = vld [vmem:[#allocation2 + $0x78] sm:$0xff]  ;;  %v707_v11 = vsub.f32 %v1181_v15, %v1168_v1 }
  0x17   : > { %v288_v23 = vmul.f32 %v281_v17, %v281_v17  ;;  %304 = vst [vmem:[#allocation1 + $0x1] ss:$2 sm:$0xff] %v281_v17  ;;  %v1193_v26 = vsub.f32 %v281_v17, %v1168_v1  ;;  %453 = vmatpush.msra.mxu3 %v259_v20  ;;  %419 = vmatpush.msra.mxu2 %v225_v24  ;;  %v277_v38 = vrot.slane %v1196_v35, 4  ;;  %v251_v40 = vld [vmem:[#allocation2 + $0x178] sm:$0xff]  ;;  %v224_v41 = vld [vmem:[#allocation2 + $0xa0] sm:$0xff]  ;;  %v217_v44 = vld [vmem:[#allocation2 + $0x68] sm:$0xff] }
  0x18   : > { %310 = vst [vmem:[#allocation1 + $0x20] ss:$2 sm:$0xff] %v287_v18  ;;  %348 = vmatpush.msra.mxu0 %v226_v32  ;;  %v256_v42 = vld [vmem:[#allocation2 + $0x1a0] sm:$0xff]  ;;  %383 = vmatpush.msra.mxu1 %v258_v36  ;;  %v249_v45 = vld [vmem:[#allocation2 + $0x168] sm:$0xff]  ;;  %v222_v49 = vld [vmem:[#allocation2 + $0x90] sm:$0xff]  ;;  %v292_v51 = vmul.f32 %v1168_v1, %v281_v17  ;;  %v708_v21 = vmul.f32 %v707_v11, %v707_v11 }
  0x19   : > { %312 = vst [vmem:[#allocation1 + $0x21] ss:$2 sm:$0xff] %v288_v23  ;;  %454 = vmatpush.msra.mxu3 %v257_v25  ;;  %420 = vmatpush.msra.mxu2 %v223_v29  ;;  %v282_v43 = vsel %vm278_vm0, %v1199_v37, %v277_v38  ;;  %v254_v50 = vld [vmem:[#allocation2 + $0x190] sm:$0xff]  ;;  %v215_v52 = vld [vmem:[#allocation2 + $0x58] sm:$0xff]  ;;  %v220_v54 = vld [vmem:[#allocation2 + $0x80] sm:$0xff] }
  0x1a   : > { %531 = vrot.lane.b32.xlu1 %v1176_v8, %s1116_s29  ;;  %589 = vrot.lane.b32.xlu0 %v1176_v8, %s1117_s30  ;;  %v289_v46 = vmul.f32 %v282_v43, %v282_v43  ;;  %306 = vst [vmem:[#allocation1 + $0x10] ss:$2 sm:$0xff] %v282_v43  ;;  %v1207_v47 = vsub.f32 %v282_v43, %v1168_v1  ;;  %v247_v53 = vld [vmem:[#allocation2 + $0x158] sm:$0xff]  ;;  %v252_v55 = vld [vmem:[#allocation2 + $0x180] sm:$0xff]  ;;  %v213_v59 = vld [vmem:[#allocation2 + $0x48] sm:$0xff] }
  0x1b   : > { %455 = vmatpush.msra.mxu3 %v255_v30  ;;  %421 = vmatpush.msra.mxu2 %v221_v33  ;;  %v293_v58 = vmul.f32 %v1168_v1, %v282_v43  ;;  %v245_v60 = vld [vmem:[#allocation2 + $0x148] sm:$0xff]  ;;  %v218_v61 = vld [vmem:[#allocation2 + $0x70] sm:$0xff]  ;;  %v211_v2 = vld [vmem:[#allocation2 + $0x38] sm:$0xff]  ;;  %316 = vst [vmem:[#allocation1 + $0x31] ss:$2 sm:$0xff] %v290_v62 }
  0x1c   : > { %591 = vrot.lane.b32.xlu2 %v1199_v37, %s1117_s30  ;;  %349 = vmatpush.msra.mxu0 %v224_v41  ;;  %314 = vst [vmem:[#allocation1 + $0x30] ss:$2 sm:$0xff] %v289_v46  ;;  %v250_v63 = vld [vmem:[#allocation2 + $0x170] sm:$0xff]  ;;  %v243_v3 = vld [vmem:[#allocation2 + $0x138] sm:$0xff]  ;;  %v216_v6 = vld [vmem:[#allocation2 + $0x60] sm:$0xff] }
  0x1d   : > { %456 = vmatpush.msra.mxu3 %v253_v34  ;;  %422 = vmatpush.msra.mxu2 %v219_v39  ;;  %v248_v7 = vld [vmem:[#allocation2 + $0x160] sm:$0xff]  ;;  %v209_v9 = vld [vmem:[#allocation2 + $0x28] sm:$0xff]  ;;  %v214_v12 = vld [vmem:[#allocation2 + $0x50] sm:$0xff] }
  0x1e   : > { %384 = vmatpush.msra.mxu1 %v256_v42  ;;  %350 = vmatpush.msra.mxu0 %v222_v49  ;;  %v1212_v56 = vld.sshfl [vmem:[#allocation1] sm:$0xff pattern:$0x75316420]  ;;  %v1214_v57 = vld.sshfl [vmem:[#allocation1 + $0x8] sm:$0xff pattern:$0x75316420] }
  0x1f   : > { %457 = vmatpush.msra.mxu3 %v251_v40  ;;  %423 = vmatpush.msra.mxu2 %v217_v44  ;;  %325 = vst [vmem:[#allocation1] ss:$2 sm:$0xff] %v291_v48  ;;  %v241_v10 = vld [vmem:[#allocation2 + $0x128] sm:$0xff]  ;;  %v246_v13 = vld [vmem:[#allocation2 + $0x150] sm:$0xff]  ;;  %v207_v14 = vld [vmem:[#allocation2 + $0x18] sm:$0xff] }
  0x20   : > { %385 = vmatpush.msra.mxu1 %v254_v50  ;;  %326 = vst [vmem:[#allocation1 + $0x1] ss:$2 sm:$0xff] %v292_v51  ;;  %351 = vmatpush.msra.mxu0 %v220_v54  ;;  %v239_v16 = vld [vmem:[#allocation2 + $0x118] sm:$0xff]  ;;  %v212_v17 = vld [vmem:[#allocation2 + $0x40] sm:$0xff]  ;;  %v205_v19 = vld [vmem:[#allocation2 + $0x8] sm:$0xff] }
  0x21   : > { %458 = vmatpush.msra.mxu3 %v249_v45  ;;  %424 = vmatpush.msra.mxu2 %v215_v52  ;;  %v1223_v4 = vld.sshfl [vmem:[#allocation1 + $0x10] sm:$0xff pattern:$0x75316420]  ;;  %v1225_v5 = vld.sshfl [vmem:[#allocation1 + $0x18] sm:$0xff pattern:$0x75316420] }
  0x22   : > { %535 = vrot.lane.b32.xlu1 %v1196_v35, %s1116_s29  ;;  %533 = vrot.lane.b32.xlu0 %v1199_v37, %s1116_s29  ;;  %327 = vst [vmem:[#allocation1 + $0x10] ss:$2 sm:$0xff] %v293_v58  ;;  %v244_v18 = vld [vmem:[#allocation2 + $0x140] sm:$0xff]  ;;  %v237_v20 = vld [vmem:[#allocation2 + $0x108] sm:$0xff]  ;;  %v210_v1 = vld [vmem:[#allocation2 + $0x30] sm:$0xff] }
  0x23   : > { %459 = vmatpush.msra.mxu3 %v247_v53  ;;  %386 = vmatpush.msra.mxu1 %v252_v55  ;;  %v242_v15 = vld [vmem:[#allocation2 + $0x130] sm:$0xff]  ;;  %v208_v22 = vld [vmem:[#allocation2 + $0x20] sm:$0xff]  ;;  %v321_v31 = vld.sshfl [vmem:[#allocation1 + $0x20] sm:$0xff pattern:$0x75316420] }
  0x24   : > { %425 = vmatpush.msra.mxu2 %v213_v59  ;;  %352 = vmatpush.msra.mxu0 %v218_v61  ;;  %v240_v23 = vld [vmem:[#allocation2 + $0x120] sm:$0xff]  ;;  %v206_v27 = vld [vmem:[#allocation2 + $0x10] sm:$0xff]  ;;  %v323_v33 = vld.sshfl [vmem:[#allocation1 + $0x30] sm:$0xff pattern:$0x75316420] }
  0x25   : > { %460 = vmatpush.msra.mxu3 %v245_v60  ;;  %387 = vmatpush.msra.mxu1 %v250_v63  ;;  %v238_v28 = vld [vmem:[#allocation2 + $0x110] sm:$0xff]  ;;  %v204_v29 = vld [vmem:[#allocation2] sm:$0xff] }
  0x26   : > { %426 = vmatpush.msra.mxu2 %v211_v2  ;;  %353 = vmatpush.msra.mxu0 %v216_v6  ;;  %v236_v30 = vld [vmem:[#allocation2 + $0x100] sm:$0xff]  ;;  %v324_v34 = vld.sshfl [vmem:[#allocation1 + $0x38] sm:$0xff pattern:$0x75316420]  ;;  %v729_v6 = vmul.f32 %v1193_v26, %v1193_v26 }
  0x27   : > { %461 = vmatpush.msra.mxu3 %v243_v3  ;;  %388 = vmatpush.msra.mxu1 %v248_v7  ;;  %v328_v24 = vld.sshfl [vmem:[#allocation1] sm:$0xff pattern:$0x75316420]  ;;  %v329_v25 = vld.sshfl [vmem:[#allocation1 + $0x8] sm:$0xff pattern:$0x75316420] }
  0x28   : > { %427 = vmatpush.msra.mxu2 %v209_v9  ;;  %354 = vmatpush.msra.mxu0 %v214_v12  ;;  %710 = vst [vmem:[#allocation1] ss:$2 sm:$0xff] %v708_v21  ;;  %v322_v32 = vld.sshfl [vmem:[#allocation1 + $0x28] sm:$0xff pattern:$0x75316420] }
  0x29   : > { %462 = vmatpush.msra.mxu3 %v241_v10  ;;  %389 = vmatpush.msra.mxu1 %v246_v13  ;;  %v330_v36 = vld.sshfl [vmem:[#allocation1 + $0x10] sm:$0xff pattern:$0x75316420]  ;;  %v331_v38 = vld.sshfl [vmem:[#allocation1 + $0x18] sm:$0xff pattern:$0x75316420] }
  0x2a   : > { %428 = vmatpush.msra.mxu2 %v207_v14  ;;  %355 = vmatpush.msra.mxu0 %v212_v17 }
  0x2b   : > { %463 = vmatpush.msra.mxu3 %v239_v16  ;;  %390 = vmatpush.msra.mxu1 %v244_v18 }
  0x2c   : > { %429 = vmatpush.msra.mxu2 %v205_v19  ;;  %356 = vmatpush.msra.mxu0 %v210_v1 }
  0x2d   : > { %464 = vmatpush.msra.mxu3 %v237_v20  ;;  %430 = vmatmul.f32.vlgmr.msra.gmra.mxu2 %v1212_v56 }
  0x2e   : > { %465 = vmatmul.f32.vlgmr.msra.gmra.mxu3 %v1214_v57  ;;  %391 = vmatpush.msra.mxu1 %v242_v15 }
  0x2f   : > { %593 = vrot.lane.b32.xlu2 %v1196_v35, %s1117_s30  ;;  %357 = vmatpush.msra.mxu0 %v208_v22  ;;  %v712_v12 = vld.sshfl [vmem:[#allocation1 + $0x8] sm:$0xff pattern:$0x75316420] }
  0x30   : > { %392 = vmatpush.msra.mxu1 %v240_v23  ;;  %v751_v23 = vmul.f32 %v1207_v47, %v1207_v47 }
  0x31   : > { %358 = vmatpush.msra.mxu0 %v206_v27 }
  0x32   : > { %393 = vmatpush.msra.mxu1 %v238_v28 }
  0x33   : > { %359 = vmatpush.msra.mxu0 %v204_v29 }
  0x34   : > { %394 = vmatpush.msra.mxu1 %v236_v30  ;;  %360 = vmatmul.f32.vlgmr.msra.gmra.mxu0 %v1212_v56 }
  0x35   : > { %395 = vmatmul.f32.vlgmr.msra.gmra.mxu1 %v1214_v57  ;;  %433 = vmatmul.f32.gmra.mxu2 %v1223_v4 }
  0x36   : > { %468 = vmatmul.f32.gmra.mxu3 %v1225_v5 }
  0x3c   : > { %363 = vmatmul.f32.gmra.mxu0 %v1223_v4 }
  0x3d   : > { %398 = vmatmul.f32.gmra.mxu1 %v1225_v5  ;;  %436 = vmatmul.f32.gmra.mxu2 %v321_v31 }
  0x3e   : > { %471 = vmatmul.f32.gmra.mxu3 %v322_v32 }
  0x44   : > { %366 = vmatmul.f32.gmra.mxu0 %v321_v31 }
  0x45   : > { %401 = vmatmul.f32.gmra.mxu1 %v322_v32  ;;  %439 = vmatmul.f32.gmra.mxu2 %v323_v33 }
  0x46   : > { %474 = vmatmul.f32.gmra.mxu3 %v324_v34 }
  0x4c   : > { %369 = vmatmul.f32.gmra.mxu0 %v323_v33 }
  0x4d   : > { %404 = vmatmul.f32.gmra.mxu1 %v324_v34  ;;  %442 = vmatmul.f32.gmra.mxu2 %v328_v24 }
  0x4e   : > { %477 = vmatmul.f32.gmra.mxu3 %v329_v25 }
  0x54   : > { %372 = vmatmul.f32.gmra.mxu0 %v328_v24 }
  0x55   : > { %407 = vmatmul.f32.gmra.mxu1 %v329_v25  ;;  %445 = vmatmul.f32.gmra.mxu2 %v330_v36 }
  0x56   : > { %480 = vmatmul.f32.gmra.mxu3 %v331_v38 }
  0x5c   : > { %375 = vmatmul.f32.gmra.mxu0 %v330_v36 }
  0x5d   : > { %410 = vmatmul.f32.gmra.mxu1 %v331_v38 }
  0x76   : > { %v592_v39 = vpop.permute.xlu2 %591 }
  0x77   : > { %v604_v40 = vsub.f32 %v1199_v37, %v592_v39 }
  0x79   : > { %643 = vrot.lane.b32.xlu1 %v604_v40, %s1118_s4 }
  0x84   : > { %v530_v41 = vpop.permute.xlu1 %529  ;;  %v588_v42 = vpop.permute.xlu0 %587 }
  0x85   : > { %v602_v43 = vsub.f32 %v1166_v0, %v588_v42  ;;  %v544_v55 = vsub.f32 %v1166_v0, %v530_v41 }
  0x87   : > { %639 = vrot.lane.b32.xlu2 %v602_v43, %s1118_s4  ;;  %v548_v56 = vmul.f32 %v544_v55, %v544_v55 }
  0x89   : > { %v594_v51 = vpop.permute.xlu2 %593 }
  0x8a   : > { %v597_v53 = vsel %vm595_vm2, %v592_v39, %v594_v51 }
  0x8b   : > { %v605_v54 = vsub.f32 %v1196_v35, %v597_v53 }
  0x8c   : > { %v532_v44 = vpop.permute.xlu1 %531  ;;  %v590_v45 = vpop.permute.xlu0 %589 }
  0x8d   : > { %v538_v46 = vsel %vm537_vm1, %v530_v41, %v532_v44  ;;  %v596_v48 = vsel %vm595_vm2, %v588_v42, %v590_v45 }
  0x8e   : > { %v545_v49 = vsub.f32 %v1176_v8, %v538_v46  ;;  %v603_v50 = vsub.f32 %v1176_v8, %v596_v48 }
  0x8f   : > { %645 = vrot.lane.b32.xlu2 %v605_v54, %s1118_s4 }
  0x90   : > { %v549_v52 = vmul.f32 %v545_v49, %v545_v49  ;;  %641 = vrot.lane.b32.xlu0 %v603_v50, %s1118_s4 }
  0x92   : > { %558 = vrot.lane.b32.xlu1 %v549_v52, %s1119_s5 }
  0x94   : > { %v536_v57 = vpop.permute.xlu1 %535  ;;  %v534_v58 = vpop.permute.xlu0 %533 }
  0x95   : > { %v539_v59 = vsel %vm537_vm1, %v534_v58, %v536_v57  ;;  %v546_v60 = vsub.f32 %v1199_v37, %v534_v58  ;;  %v711_v37 = vld.sshfl [vmem:[#allocation1] sm:$0xff pattern:$0x75316420] }
  0x96   : > { %v547_v8 = vsub.f32 %v1196_v35, %v539_v59  ;;  %731 = vst [vmem:[#allocation1] ss:$2 sm:$0xff] %v729_v6  ;;  %v715_v6 = vsel %vm278_vm0, %v711_v37, 0.0 }
  0x97   : > { %v550_v61 = vmul.f32 %v546_v60, %v546_v60 }
  0x98   : > { %556 = vrot.lane.b32.xlu0 %v548_v56, %s1119_s5  ;;  %v551_v62 = vmul.f32 %v547_v8, %v547_v8 }
  0x99   : > { %560 = vrot.lane.b32.xlu2 %v550_v61, %s1119_s5 }
  0x9d   : > { %v1260_v28 = vld.sshfl [vmem:[#allocation1] sm:$0xff pattern:$0x75316420]  ;;  %v1266_v31 = vld.sshfl [vmem:[#allocation1 + $0x8] sm:$0xff pattern:$0x75316420] }
  0x9e   : > { %753 = vst [vmem:[#allocation1] ss:$2 sm:$0xff] %v751_v23 }
  0xa0   : > { %562 = vrot.lane.b32.xlu0 %v551_v62, %s1119_s5 }
  0xb0   : > { %v431_v63 = vpop.f32.mrf.mxu2 }
  0xb1   : > { %v466_v2 = vpop.f32.mrf.mxu3  ;;  %v361_v0 = vpop.f32.mrf.mxu0 }
  0xb2   : > { %v396_v3 = vpop.f32.mrf.mxu1  ;;  %v467_v10 = vadd.f32 %v466_v2, %v431_v63 }
  0xb3   : > { %v397_v13 = vadd.f32 %v396_v3, %v361_v0 }
  0xb4   : > { %v496_v35 = vrot.slane %v467_v10, 4 }
  0xb6   : > { %v503_v1 = vsel %vm278_vm0, %v496_v35, %v397_v13  ;;  %v502_v25 = vsel %vm278_vm0, %v397_v13, %v496_v35 }
  0xb7   : > { %v1255_v24 = vrot.slane %v503_v1, 4  ;;  %v776_v34 = vmul.f32 %v502_v25, %v502_v25 }
  0xb8   : > { %v434_v4 = vpop.f32.mrf.mxu2 }
  0xb9   : > { %v469_v5 = vpop.f32.mrf.mxu3  ;;  %v364_v7 = vpop.f32.mrf.mxu0  ;;  %v826_v47 = vmul.f32 %v1255_v24, %v1255_v24 }
  0xba   : > { %v399_v9 = vpop.f32.mrf.mxu1  ;;  %v470_v11 = vadd.f32 %v469_v5, %v434_v4 }
  0xbb   : > { %v400_v16 = vadd.f32 %v399_v9, %v364_v7  ;;  %v716_v7 = vsel %vm278_vm0, %v712_v12, 0.0 }
  0xbc   : > { %v497_v14 = vrot.slane %v470_v11, 4  ;;  %v717_v35 = vadd.f32 %v716_v7, %v715_v6 }
  0xbe   : > { %v506_v26 = vsel %vm278_vm0, %v497_v14, %v400_v16  ;;  %v1263_v29 = vsel %vm278_vm0, %v400_v16, %v497_v14 }
  0xbf   : > { %v1258_v27 = vrot.slane %v506_v26, 4  ;;  %v875_v41 = vmul.f32 %v1263_v29, %v1263_v29 }
  0xc0   : > { %v437_v17 = vpop.f32.mrf.mxu2 }
  0xc1   : > { %v472_v18 = vpop.f32.mrf.mxu3  ;;  %v367_v20 = vpop.f32.mrf.mxu0  ;;  %v777_v40 = vmul.f32 %v1258_v27, %v1258_v27 }
  0xc2   : > { %v473_v19 = vadd.f32 %v472_v18, %v437_v17  ;;  %v402_v21 = vpop.f32.mrf.mxu1  ;;  %v775_v17 = vmul.f32 %v1258_v27, %v502_v25 }
  0xc3   : > { %v403_v22 = vadd.f32 %v402_v21, %v367_v20  ;;  %v883_v46 = vadd.f32 %v875_v41, %v777_v40  ;;  %v786_v50 = vadd.f32 %v777_v40, %v776_v34  ;;  %v834_v51 = vadd.f32 %v826_v47, %v777_v40 }
  0xc4   : > { %v498_v15 = vrot.slane %v473_v19, 4  ;;  %v781_v19 = vmul.f32 2.0, %v775_v17  ;;  %v825_v21 = vmul.f32 %v1258_v27, %v1255_v24 }
  0xc5   : > { %v884_v59 = vadd.f32 0.0001, %v883_v46  ;;  %v787_v60 = vadd.f32 0.0001, %v786_v50  ;;  %v835_v2 = vadd.f32 0.0001, %v834_v51 }
  0xc6   : > { %v509_v30 = vsel %vm278_vm0, %v498_v15, %v403_v22  ;;  %v508_v44 = vsel %vm278_vm0, %v403_v22, %v498_v15 }
  0xc7   : > { %v510_v42 = vrot.slane %v509_v30, 4  ;;  %v778_v52 = vsub.f32 %v508_v44, %v776_v34  ;;  %v737_v44 = vsel %vm278_vm0, %v1266_v31, 0.0 }
  0xc8   : > { %v440_v32 = vpop.f32.mrf.mxu2 }
  0xc9   : > { %v475_v33 = vpop.f32.mrf.mxu3  ;;  %v370_v38 = vpop.f32.mrf.mxu0  ;;  %v827_v53 = vsub.f32 %v510_v42, %v826_v47 }
  0xca   : > { %v476_v36 = vadd.f32 %v475_v33, %v440_v32  ;;  %v405_v39 = vpop.f32.mrf.mxu1  ;;  %718 = vadd.xlane.f32.xlu0 %v717_v35  ;;  %v782_v32 = vadd.f32 0.0001, %v781_v19 }
  0xcb   : > { %v406_v43 = vadd.f32 %v405_v39, %v370_v38 }
  0xcc   : > { %v499_v45 = vrot.slane %v476_v36, 4 }
  0xce   : > { %v511_v48 = vsel %vm278_vm0, %v406_v43, %v499_v45  ;;  %v512_v49 = vsel %vm278_vm0, %v499_v45, %v406_v43  ;;  %v736_v43 = vsel %vm278_vm0, %v1260_v28, 0.0 }
  0xcf   : > { %v513_v54 = vrot.slane %v512_v49, 4  ;;  %v876_v55 = vsub.f32 %v511_v48, %v875_v41  ;;  %v738_v48 = vadd.f32 %v737_v44, %v736_v43  ;;  %v874_v49 = vmul.f32 %v1258_v27, %v1263_v29  ;;  %v1308_v29 = vld.sshfl [vmem:[#allocation1] sm:$0xff pattern:$0x75316420] }
  0xd0   : > { %v443_v57 = vpop.f32.mrf.mxu2 }
  0xd1   : > { %v779_v56 = vsub.f32 %v513_v54, %v777_v40  ;;  %v478_v58 = vpop.f32.mrf.mxu3  ;;  %v373_v61 = vpop.f32.mrf.mxu0  ;;  %v829_v54 = vmul.f32 2.0, %v825_v21  ;;  %739 = vadd.xlane.f32.xlu2 %v738_v48  ;;  %v878_v7 = vmul.f32 2.0, %v874_v49 }
  0xd2   : > { %v479_v8 = vadd.f32 %v478_v58, %v443_v57  ;;  %v408_v62 = vpop.f32.mrf.mxu1 }
  0xd3   : > { %v788_v63 = vadd.f32 %v779_v56, %v778_v52  ;;  %v836_v0 = vadd.f32 %v827_v53, %v779_v56  ;;  %v885_v3 = vadd.f32 %v876_v55, %v779_v56  ;;  %v409_v5 = vadd.f32 %v408_v62, %v373_v61  ;;  %v1312_v61 = vld.sshfl [vmem:[#allocation1 + $0x8] sm:$0xff pattern:$0x75316420] }
  0xd4   : > { %v500_v4 = vrot.slane %v479_v8, 4  ;;  %v606_v8 = vlaneseq }
  0xd5   : > { %v789_v9 = vadd.f32 0.0009, %v788_v63  ;;  %v837_v10 = vadd.f32 0.0009, %v836_v0  ;;  %v886_v11 = vadd.f32 0.0009, %v885_v3 }
  0xd6   : > { %v514_v18 = vsel %vm278_vm0, %v409_v5, %v500_v4  ;;  %v515_v37 = vsel %vm278_vm0, %v500_v4, %v409_v5 }
  0xd7   : > { %v790_v13 = vmul.f32 %v789_v9, %v787_v60  ;;  %v1279_v14 = vmul.f32 %v837_v10, %v835_v2  ;;  %v1281_v16 = vmul.f32 %v886_v11, %v884_v59  ;;  %v780_v12 = vsub.f32 %v514_v18, %v775_v17 }
  0xd8   : > { %v516_v20 = vrot.slane %v515_v37, 4  ;;  %v446_v1 = vpop.f32.mrf.mxu2  ;;  %v830_v2 = vadd.f32 0.0001, %v829_v54  ;;  %v607_v10 = vand.u32 127, %v606_v8  ;;  %v879_v37 = vadd.f32 0.0001, %v878_v7 }
  0xd9   : > { %1061 = vrcp.f32 %v790_v13  ;;  %v481_v26 = vpop.f32.mrf.mxu3  ;;  %v783_v22 = vmul.f32 2.0, %v780_v12  ;;  %v800_v36 = vand.u32 2147483647, %v790_v13  ;;  %v802_v38 = vand.u32 2147483648, %v790_v13  ;;  %v376_v40 = vpop.f32.mrf.mxu0 }
  0xda   : > { %1063 = vrcp.f32 %v1279_v14  ;;  %v482_v34 = vadd.f32 %v481_v26, %v446_v1  ;;  %v828_v39 = vsub.f32 %v516_v20, %v825_v21  ;;  %v411_v24 = vpop.f32.mrf.mxu1  ;;  %vm796_vm4 = vweird.f32 %v790_v13 }
  0xdb   : > { %1065 = vrcp.f32 %v1281_v16  ;;  %v784_v41 = vadd.f32 0.0009, %v783_v22  ;;  %v412_v52 = vadd.f32 %v411_v24, %v376_v40  ;;  %vm844_vm5 = vweird.f32 %v1279_v14 }
  0xdc   : > { %v501_v51 = vrot.slane %v482_v34, 4  ;;  %vm801_vm7 = vcmp.eq.f32.partialorder %v800_v36, 8.507059e+37  ;;  %v803_v31 = vor.u32 1.1754944e-38, %v802_v38  ;;  %v831_v55 = vmul.f32 2.0, %v828_v39 }
  0xdd   : > { %v785_v28 = vmul.f32 %v784_v41, %v782_v32  ;;  %v850_v59 = vand.u32 2147483648, %v1279_v14  ;;  %v848_v63 = vand.u32 2147483647, %v1279_v14  ;;  %vm893_vm11 = vweird.f32 %v1281_v16 }
  0xde   : > { %v517_v60 = vsel %vm278_vm0, %v412_v52, %v501_v51  ;;  %v832_v0 = vadd.f32 0.0009, %v831_v55  ;;  %v899_v11 = vand.u32 2147483648, %v1281_v16  ;;  %v897_v18 = vand.u32 2147483647, %v1281_v16 }
  0xdf   : > { %v1062_v15 = vpop.eup %1061  ;;  %v877_v4 = vsub.f32 %v517_v60, %v874_v49  ;;  %v851_v9 = vor.u32 1.1754944e-38, %v850_v59  ;;  %vm849_vm10 = vcmp.eq.f32.partialorder %v848_v63, 8.507059e+37  ;;  %v608_v21 = vadd.s32 128, %v607_v10 }
  0xe0   : > { %v1290_v23 = vpop.eup %1063  ;;  %v792_v25 = vmul.f32 %v1062_v15, %v790_v13  ;;  %vm797_vm3 = vweird.f32 %v1062_v15  ;;  %v833_v13 = vmul.f32 %v832_v0, %v830_v2  ;;  %v900_v20 = vor.u32 1.1754944e-38, %v899_v11 }
  0xe1   : > { %v1292_v30 = vpop.eup %1065  ;;  %v840_v33 = vmul.f32 %v1290_v23, %v1279_v14  ;;  %vm798_vm6 = vmor %vm796_vm4, %vm797_vm3  ;;  %vm845_vm8 = vweird.f32 %v1290_v23  ;;  %v640_v6 = vpop.permute.xlu2 %639  ;;  %v880_v14 = vmul.f32 2.0, %v877_v4  ;;  %v613_v1 = vand.u32 15, %v607_v10 }
  0xe2   : > { %v793_v47 = vsub.f32 1.0, %v792_v25  ;;  %v889_v45 = vmul.f32 %v1292_v30, %v1281_v16  ;;  %vm846_vm9 = vmor %vm844_vm5, %vm845_vm8  ;;  %vm894_vm12 = vweird.f32 %v1292_v30  ;;  %vm898_vm14 = vcmp.eq.f32.partialorder %v897_v18, 8.507059e+37 }
  0xe3   : > { %v841_v42 = vsub.f32 1.0, %v840_v33  ;;  %vm1324_vm13 = vmor %vm893_vm11, %vm894_vm12  ;;  %v881_v22 = vadd.f32 0.0009, %v880_v14  ;;  %v620_v32 = vand.u32 15, %v608_v21  ;;  %vm1331_vm1 = vcmp.ne.s32.totalorder %v613_v1, 15 }
  0xe4   : > { %v794_v46 = vmul.f32 %v1062_v15, %v793_v47  ;;  %v890_v27 = vsub.f32 1.0, %v889_v45  ;;  %vm666_vm3 = vcmask 1035264   ;;  %vm564_vm4 = vcmask 916480  }
  0xe5   : > { %v842_v50 = vmul.f32 %v1290_v23, %v841_v42  ;;  %v882_v36 = vmul.f32 %v881_v22, %v879_v37  ;;  %vm634_vm2 = vcmp.ne.s32.totalorder %v620_v32, 15  ;;  %vm575_vm5 = vcmask 912384  }
  0xe6   : > { %v795_v53 = vadd.f32 %v1062_v15, %v794_v46  ;;  %v891_v5 = vmul.f32 %v1292_v30, %v890_v27  ;;  %v759_v10 = vsel %vm278_vm0, %v1312_v61, 0.0  ;;  %v1120_v12 = vmov 960.0  }
  0xe7   : > { %v843_v57 = vadd.f32 %v1290_v23, %v842_v50  ;;  %1067 = vrcp.f32 %v1120_v12  ;;  %v1121_v21 = vmov 3.0  }
  0xe8   : > { %v799_v56 = vsel %vm798_vm6, %v1062_v15, %v795_v53  ;;  %v892_v17 = vadd.f32 %v1292_v30, %v891_v5  ;;  %1069 = vrcp.f32 %v1121_v21 }
  0xe9   : > { %v804_v58 = vsel %vm801_vm7, %v803_v31, %v799_v56  ;;  %v847_v3 = vsel %vm846_vm9, %v1290_v23, %v843_v57  ;;  %v646_v25 = vpop.permute.xlu2 %645  ;;  %vm926_vm7 = vcmask 0  }
  0xea   : > { %v805_v62 = vmul.f32 %v804_v58, %v785_v28  ;;  %v852_v35 = vsel %vm849_vm10, %v851_v9, %v847_v3  ;;  %v896_v23 = vsel %vm1324_vm13, %v1292_v30, %v892_v17  ;;  %v657_v43 = vsel %vm634_vm2, %v646_v25, 0.0 }
  0xeb   : > { %v853_v19 = vmul.f32 %v852_v35, %v833_v13  ;;  %v644_v16 = vpop.permute.xlu1 %643  ;;  %v901_v33 = vsel %vm898_vm14, %v900_v20, %v896_v23  ;;  %v661_v52 = vmul.f32 %v657_v43, %v657_v43  ;;  %v758_v9 = vsel %vm278_vm0, %v1308_v29, 0.0 }
  0xec   : > { %807 = vst [vmem:[#allocation1] ss:$2 sm:$0xff] %v805_v62  ;;  %v649_v47 = vsel %vm647_vm15, %v644_v16, %v646_v25  ;;  %v902_v38 = vmul.f32 %v901_v33, %v882_v36  ;;  %v760_v11 = vadd.f32 %v759_v10, %v758_v9 }
  0xed   : > { %v656_v39 = vsel %vm1331_vm1, %v649_v47, 0.0  ;;  %v667_v56 = vsel %vm666_vm3, %v661_v52, 0.0  ;;  %v1068_v61 = vpop.eup %1067 }
  0xee   : > { %v660_v48 = vmul.f32 %v656_v39, %v656_v39  ;;  %v679_v25 = vmul.f32 960.0, %v1068_v61 }
  0xf0   : > { %v664_v28 = vsel %vm278_vm0, %v660_v48, 0.0 }
  0xf3   : > { %v808_v26 = vld.sshfl [vmem:[#allocation1] sm:$0xff pattern:$0x75316420]  ;;  %v809_v15 = vld.sshfl [vmem:[#allocation1 + $0x8] sm:$0xff pattern:$0x75316420]  ;;  %v561_v8 = vpop.permute.xlu2 %560 }
  0xf4   : > { %855 = vst [vmem:[#allocation1] ss:$2 sm:$0xff] %v853_v19  ;;  %v812_v59 = vsel %vm278_vm0, %v808_v26, 0.0  ;;  %v813_v60 = vsel %vm278_vm0, %v809_v15, 0.0  ;;  %v1070_v26 = vpop.eup %1069 }
  0xf5   : > { %v814_v3 = vadd.f32 %v813_v60, %v812_v59  ;;  %v699_v32 = vmul.f32 3.0, %v1070_v26  ;;  %vm703_vm6 = vweird.f32 %v1070_v26 }
  0xfb   : > { %v856_v30 = vld.sshfl [vmem:[#allocation1] sm:$0xff pattern:$0x75316420]  ;;  %v857_v40 = vld.sshfl [vmem:[#allocation1 + $0x8] sm:$0xff pattern:$0x75316420] }
  0xfc   : > { %v860_v41 = vsel %vm278_vm0, %v856_v30, 0.0  ;;  %v861_v42 = vsel %vm278_vm0, %v857_v40, 0.0  ;;  %904 = vst [vmem:[#allocation1] ss:$2 sm:$0xff] %v902_v38  ;;  %v680_v30 = vsub.f32 1.0, %v679_v25 }
  0xfd   : > { %v862_v46 = vadd.f32 %v861_v42, %v860_v41  ;;  %v700_v41 = vsub.f32 1.0, %v699_v32 }
  0xff   : > { %863 = vadd.xlane.f32.xlu0 %v862_v46  ;;  %v681_v46 = vmul.f32 %v1068_v61, %v680_v30 }
 0x102   : > { %v642_v24 = vpop.permute.xlu0 %641 }
 0x103   : > { %v648_v44 = vsel %vm647_vm15, %v640_v6, %v642_v24  ;;  %v655_v45 = vsel %vm634_vm2, %v642_v24, 0.0  ;;  %v905_v35 = vld.sshfl [vmem:[#allocation1] sm:$0xff pattern:$0x75316420] }
 0x104   : > { %v654_v49 = vsel %vm1331_vm1, %v648_v44, 0.0  ;;  %v659_v50 = vmul.f32 %v655_v45, %v655_v45  ;;  %v559_v27 = vpop.permute.xlu1 %558  ;;  %v906_v13 = vld.sshfl [vmem:[#allocation1 + $0x8] sm:$0xff pattern:$0x75316420]  ;;  %v909_v14 = vsel %vm278_vm0, %v905_v35, 0.0 }
 0x105   : > { %v658_v51 = vmul.f32 %v654_v49, %v654_v49  ;;  %v571_v62 = vsel %vm564_vm4, %v559_v27, 0.0  ;;  %v910_v17 = vsel %vm278_vm0, %v906_v13, 0.0 }
 0x106   : > { %v662_v53 = vsel %vm647_vm15, %v659_v50, 0.0  ;;  %v911_v18 = vadd.f32 %v910_v17, %v909_v14 }
 0x107   : > { %v663_v54 = vadd.f32 %v662_v53, %v658_v51  ;;  %v701_v51 = vmul.f32 %v1070_v26, %v700_v41 }
 0x109   : > { %v665_v31 = vadd.f32 %v664_v28, %v663_v54  ;;  %v702_v59 = vadd.f32 %v1070_v26, %v701_v51 }
 0x10a   : > { %v557_v55 = vpop.permute.xlu0 %556 }
 0x10b   : > { %v668_v57 = vadd.f32 %v667_v56, %v665_v31  ;;  %v565_v58 = vsel %vm564_vm4, %v557_v55, %v559_v27  ;;  %v682_v55 = vadd.f32 %v1068_v61, %v681_v46 }
 0x10c   : > { %v572_v2 = vadd.f32 %v571_v62, %v565_v58 }
 0x10d   : > { %669 = vadd.xlane.f32.xlu2 %v668_v57 }
 0x112   : > { %v563_v63 = vpop.permute.xlu0 %562 }
 0x113   : > { %v566_v0 = vsel %vm564_vm4, %v561_v8, %v563_v63  ;;  %v576_v6 = vsel %vm575_vm5, %v563_v63, 0.0 }
 0x114   : > { %v573_v4 = vsel %vm278_vm0, %v566_v0, 0.0  ;;  %vm683_vm0 = vweird.f32 %v1068_v61 }
 0x115   : > { %815 = vadd.xlane.f32.xlu2 %v814_v3  ;;  %v574_v5 = vadd.f32 %v573_v4, %v572_v2  ;;  %v684_v2 = vsel %vm683_vm0, %v1068_v61, %v682_v55 }
 0x117   : > { %v577_v7 = vadd.f32 %v576_v6, %v574_v5  ;;  %v704_v5 = vsel %vm703_vm6, %v1070_v26, %v702_v59 }
 0x119   : > { %578 = vadd.xlane.f32.xlu1 %v577_v7 }
 0x121   : > { %761 = vadd.xlane.f32.xlu1 %v760_v11 }
 0x129   : > { %912 = vadd.xlane.f32.xlu1 %v911_v18 }
 0x13d   : > { %v719_v19 = vpop.xlane.xlu0 %718 }
 0x13e   : > { %v720_v29 = vrot.slane %v719_v19, 4 }
 0x140   : > { %v721_v22 = vadd.f32 %v720_v29, %v719_v19 }
 0x142   : > { %v722_v47 = vrot.slane %v721_v22, 2 }
 0x144   : > { %v740_v37 = vpop.xlane.xlu2 %739  ;;  %v723_v48 = vadd.f32 %v722_v47, %v721_v22 }
 0x145   : > { %v741_v15 = vrot.slane %v740_v37, 4 }
 0x146   : > { %v724_v56 = vrot.slane %v723_v48, 1 }
 0x147   : > { %v742_v34 = vadd.f32 %v741_v15, %v740_v37 }
 0x148   : > { %v725_v6 = vadd.f32 %v724_v56, %v723_v48 }
 0x149   : > { %v743_v42 = vrot.slane %v742_v34, 2 }
 0x14b   : > { %v744_v53 = vadd.f32 %v743_v42, %v742_v34 }
 0x14d   : > { %v745_v0 = vrot.slane %v744_v53, 1 }
 0x14f   : > { %v746_v9 = vadd.f32 %v745_v0, %v744_v53 }
 0x172   : > { %v864_v33 = vpop.xlane.xlu0 %863 }
 0x173   : > { %v865_v40 = vrot.slane %v864_v33, 4 }
 0x175   : > { %v866_v49 = vadd.f32 %v865_v40, %v864_v33 }
 0x177   : > { %v867_v57 = vrot.slane %v866_v49, 2 }
 0x179   : > { %v868_v3 = vadd.f32 %v867_v57, %v866_v49 }
 0x17b   : > { %v869_v14 = vrot.slane %v868_v3, 1 }
 0x17d   : > { %v870_v19 = vadd.f32 %v869_v14, %v868_v3 }
 0x180   : > { %v670_v20 = vpop.xlane.xlu2 %669 }
 0x181   : > { %v671_v1 = vrot.slane %v670_v20, 4 }
 0x183   : > { %v672_v23 = vadd.f32 %v671_v1, %v670_v20 }
 0x185   : > { %v673_v36 = vrot.slane %v672_v23, 2 }
 0x187   : > { %v674_v45 = vadd.f32 %v673_v36, %v672_v23 }
 0x188   : > { %v816_v16 = vpop.xlane.xlu2 %815 }
 0x189   : > { %v817_v38 = vrot.slane %v816_v16, 4  ;;  %v675_v31 = vrot.slane %v674_v45, 1 }
 0x18b   : > { %v818_v44 = vadd.f32 %v817_v38, %v816_v16  ;;  %v676_v63 = vadd.f32 %v675_v31, %v674_v45 }
 0x18c   : > { %v579_v39 = vpop.xlane.xlu1 %578 }
 0x18d   : > { %v580_v24 = vrot.slane %v579_v39, 4  ;;  %v819_v54 = vrot.slane %v818_v44, 2 }
 0x18f   : > { %v581_v43 = vadd.f32 %v580_v24, %v579_v39  ;;  %v820_v62 = vadd.f32 %v819_v54, %v818_v44 }
 0x191   : > { %v582_v50 = vrot.slane %v581_v43, 2  ;;  %v821_v11 = vrot.slane %v820_v62, 1 }
 0x193   : > { %v583_v52 = vadd.f32 %v582_v50, %v581_v43  ;;  %v822_v37 = vadd.f32 %v821_v11, %v820_v62 }
 0x194   : > { %v762_v28 = vpop.xlane.xlu1 %761 }
 0x195   : > { %v763_v27 = vrot.slane %v762_v28, 4  ;;  %v584_v58 = vrot.slane %v583_v52, 1 }
 0x197   : > { %v764_v60 = vadd.f32 %v763_v27, %v762_v28  ;;  %v585_v8 = vadd.f32 %v584_v58, %v583_v52 }
 0x199   : > { %v765_v4 = vrot.slane %v764_v60, 2  ;;  %1014 = vpush %v585_v8 }
 0x19a   : > { %1016 = vpush %v676_v63 }
 0x19b   : > { %1018 = vpush %v684_v2  ;;  %v766_v7 = vadd.f32 %v765_v4, %v764_v60 }
 0x19c   : > { %1020 = vpush %v704_v5  ;;  %v913_v10 = vpop.xlane.xlu1 %912 }
 0x19d   : > { %1022 = vpush %v725_v6  ;;  %v914_v35 = vrot.slane %v913_v10, 4  ;;  %v767_v13 = vrot.slane %v766_v7, 1 }
 0x19e   : > { %1024 = vpush %v746_v9 }
 0x19f   : > { %v915_v17 = vadd.f32 %v914_v35, %v913_v10  ;;  %v768_v18 = vadd.f32 %v767_v13, %v766_v7 }
 0x1a1   : > { %v916_v12 = vrot.slane %v915_v17, 2  ;;  %1026 = vpush %v768_v18 }
 0x1a2   : > { %1028 = vpush %v822_v37 }
 0x1a3   : > { %v917_v20 = vadd.f32 %v916_v12, %v915_v17  ;;  %1030 = vpush %v870_v19 }
 0x1a5   : > { %v918_v21 = vrot.slane %v917_v20, 1 }
 0x1a7   : > { %v919_v29 = vadd.f32 %v918_v21, %v917_v20 }
 0x1a9   : > { %1032 = vpush %v919_v29 }
 0x1ca   : > { %s1015_s6 = spop %1014 }
 0x1cb   : > { %s1017_s7 = spop %1016 }
 0x1cc   : > { %s1019_s8 = spop %1018 }
 0x1cd   : > { %s686_s9 = smul.f32 %s1019_s8, %s1015_s6  ;;  %s1021_s10 = spop %1020 }
 0x1ce   : > { %s695_s11 = smul.f32 %s1019_s8, %s1017_s7  ;;  %s1023_s13 = spop %1022 }
 0x1cf   : > { %s727_s14 = smul.f32 0.0009765625, %s1023_s13  ;;  %s1025_s15 = spop %1024 }
 0x1d0   : > { %s696_s17 = sadd.f32 %s695_s11, %s686_s9  ;;  %s748_s18 = smul.f32 0.0009765625, %s1025_s15 }
 0x1d1   : > { %s203_s13 = scalar_lea.vmem %s1365_s3, %s1371_s16 }
 0x1d2   : > { %s697_s19 = smul.f32 2.0, %s696_s17  ;;  %s749_s20 = sadd.f32 %s748_s18, %s727_s14 }
 0x1d3   : > { %s1027_s21 = spop %1026 }
 0x1d4   : > { %s706_s22 = smul.f32 %s1021_s10, %s697_s19  ;;  %s1029_s23 = spop %1028 }
 0x1d5   : > { %s770_s24 = smul.f32 0.0009765625, %s1027_s21  ;;  %s1031_s25 = spop %1030 }
 0x1d6   : > { %s772_s26 = smul.f32 0.0001, %s706_s22 }
 0x1d7   : > { %s771_s27 = sadd.f32 %s770_s24, %s749_s20  ;;  %s824_s28 = smul.f32 0.0009765625, %s1029_s23 }
 0x1d8   : > { %s872_s29 = smul.f32 0.0009765625, %s1031_s25 }
 0x1d9   : > { %s773_s30 = sadd.f32 %s772_s26, %s771_s27 }
 0x1da   : > { %s1033_s4 = spop %1032  ;;  %s873_s5 = sadd.f32 %s872_s29, %s824_s28 }
 0x1db   : > { %s921_s6 = smul.f32 0.0009765625, %s1033_s4  ;;  %s774_s7 = sadd.f32 3.0, %s773_s30 }
 0x1dd   : > { %s922_s8 = sadd.f32 %s921_s6, %s873_s5 }
 0x1df   : > { %s923_s14 = ssub.f32 %s774_s7, %s922_s8 }
 0x1e1   : > { %v924_v1 = vstv %s923_s14 }
 0x1e2   : > { %927 = vst.msk [vmem:[%s203_s13] sm:$0x1] %vm926_vm7, %v924_v1 }
 0x1e3 PF: > { %s14_s12 = sadd.s32 1, %s1111_s12  }
 0x1e4   : > { %p11_p7 = scmp.ge.s32.totalorder %s14_s12, 4  }
 0x1e6   :  { %13 = sbr.rel (!%p11_p7) target bundleno = 1 (0x1), region = 77 }
 0x1eb   :  { %945 = vsyncpa [#allocation3], 1 }
 0x1ec   :  { %947 = vsyncpa [#allocation3 + $0x1], 1 }

</bundles_post_ra>
